<compile_context>
chip_gen: v7x
topology: tpu7x:2x2x1
jax: 0.10.0
libtpu: 0.0.40
codegen_flags: <defaults>
</compile_context>

<pallas_src>
import functools

import jax
import jax.numpy as jnp
from jax.experimental import pallas as pl
from jax.experimental.pallas import tpu as pltpu


def _woq_linear_kernel(x_ref, w_ref, scale_ref, b_ref, o_ref, acc_ref):
    # x_ref:     (tm, tk) float32 activation tile
    # w_ref:     (tk, tn) int8    weight tile (weight-only quantized, pre-transposed)
    # scale_ref: (1,  tn) float32 per-output-channel dequant scale
    # b_ref:     (1,  tn) float32 bias
    # o_ref:     (tm, tn) float32 output tile
    # acc_ref:   (tm, tn) float32 VMEM accumulator (resident across the K axis)
    k = pl.program_id(2)

    @pl.when(k == 0)
    def _():
        acc_ref[...] = jnp.zeros_like(acc_ref)

    # bf16 MXU path: single bulk int8->bf16 cast of the weight tile, f32 accumulate.
    x_bf16 = x_ref[...].astype(jnp.bfloat16)
    w_bf16 = w_ref[...].astype(jnp.bfloat16)
    acc_ref[...] += jnp.dot(x_bf16, w_bf16, preferred_element_type=jnp.float32)

    @pl.when(k == pl.num_programs(2) - 1)
    def _():
        # f32 epilogue: per-channel dequant scale + bias applied once, post-accumulation.
        o_ref[...] = acc_ref[...] * scale_ref[...] + b_ref[...]


def _pick_tile(dim, candidates):
    """Largest candidate that evenly divides `dim`, else the full dim."""
    for c in candidates:
        if c <= dim and dim % c == 0:
            return c
    return dim


@functools.partial(jax.jit, static_argnames=())
def woq_int8_linear(x, w_int8_t, scale, bias):
    """y = (x @ (w_int8_t * scale)) + bias, computed inside one tiled Pallas kernel.

    x:        (M, K) float32
    w_int8_t: (K, N) int8   (pre-transposed weight)
    scale:    (N,)   float32 per-output-channel scale
    bias:     (N,)   float32
    """
    M, K = x.shape
    Kw, N = w_int8_t.shape
    assert K == Kw
    scale2 = scale.reshape(1, N).astype(jnp.float32)
    bias2 = bias.reshape(1, N).astype(jnp.float32)

    # Tile selection:
    #  - tm = M when M is tiny (WOQ decode-style GEMM); otherwise a multiple of 8.
    #  - wide, lane-dense N tiles (multiple of 128) to amortize the streamed int8
    #    weight bytes and keep stores unmasked.
    #  - K tiled last in the grid with an accumulator-resident output.
    #  Budgeted for v7x's 64 MiB VMEM: 2x(tm*tk*4 + tk*tn) + tm*tn*4 stays small.
    tm = M if M <= 256 else _pick_tile(M, (256, 128, 64, 32, 16, 8))
    tn = _pick_tile(N, (512, 384, 256, 128))
    tk = _pick_tile(K, (512, 256, 128))

    grid = (M // tm, N // tn, K // tk)

    cost = pl.CostEstimate(
        flops=2 * M * N * K,
        transcendentals=0,
        bytes_accessed=M * K * 4 + K * N * 1 + M * N * 4 + 2 * N * 4,
    )

    return pl.pallas_call(
        _woq_linear_kernel,
        out_shape=jax.ShapeDtypeStruct((M, N), jnp.float32),
        grid_spec=pltpu.PrefetchScalarGridSpec(
            num_scalar_prefetch=0,
            grid=grid,
            in_specs=[
                pl.BlockSpec((tm, tk), lambda i, j, k: (i, k)),   # activations
                pl.BlockSpec((tk, tn), lambda i, j, k: (k, j)),   # int8 weight stream
                pl.BlockSpec((1, tn), lambda i, j, k: (0, j)),    # per-channel scale
                pl.BlockSpec((1, tn), lambda i, j, k: (0, j)),    # bias
            ],
            out_specs=pl.BlockSpec((tm, tn), lambda i, j, k: (i, j)),
            scratch_shapes=[pltpu.VMEM((tm, tn), jnp.float32)],
        ),
        compiler_params=pltpu.CompilerParams(
            dimension_semantics=("parallel", "parallel", "arbitrary"),
            vmem_limit_bytes=64 * 1024 * 1024,
        ),
        cost_estimate=cost,
    )(x, w_int8_t, scale2, bias2)


class Model:
    """JAX mirror of the PyTorch Model: a Linear(K, N, bias=True); x2 is ignored."""

    def __init__(self, M, N, K, key):
        kw, kb = jax.random.split(key)
        # Deterministic float weight, then weight-only int8 quantization
        # (symmetric, per-output-channel), matching the WOQ int8 GEMM pattern.
        w_fp = jax.random.normal(kw, (N, K), dtype=jnp.float32) * 0.05
        scale = jnp.max(jnp.abs(w_fp), axis=1) / 127.0 + 1e-8               # (N,)
        w_int8 = jnp.clip(jnp.round(w_fp / scale[:, None]), -127, 127).astype(jnp.int8)
        # Store pre-transposed (K, N) once so forward never re-lays-out the weight.
        self.w_int8_t = jnp.asarray(w_int8.T)                               # (K, N) int8
        self.w_int8 = w_int8                                                # (N, K) int8 (for reference)
        self.scale = scale.astype(jnp.float32)                              # (N,)
        self.bias = (jax.random.normal(kb, (N,), dtype=jnp.float32) * 0.01)

    def forward(self, x, x2):
        del x2  # unused, as in the PyTorch module
        return woq_int8_linear(x, self.w_int8_t, self.scale, self.bias)


if __name__ == "__main__":
    # Small shapes consistent with the module: x is (M, K), output (M, N).
    # Picked so the grid actually tiles N and K (grid = (1, 1, 2) at minimum).
    M, K, N = 8, 256, 512
    key = jax.random.PRNGKey(0)
    k_x, k_x2, k_model = jax.random.split(key, 3)

    x = jax.random.normal(k_x, (M, K), dtype=jnp.float32)
    x2 = jax.random.normal(k_x2, (M, K), dtype=jnp.float32)  # unused by forward

    model = Model(M, N, K, k_model)

    y = model.forward(x, x2)
    y = jax.block_until_ready(y)

    # Pure-JAX references.
    w_deq = model.w_int8.astype(jnp.float32) * model.scale[:, None]          # (N, K)
    y_ref_f32 = x @ w_deq.T + model.bias
    # bf16-consistent reference (matches the in-kernel MXU precision exactly).
    y_ref_bf16 = (
        jnp.dot(
            x.astype(jnp.bfloat16),
            (model.w_int8_t.astype(jnp.bfloat16)),
            preferred_element_type=jnp.float32,
        )
        * model.scale[None, :]
        + model.bias
    )

    assert y.shape == (M, N)
    # Tight check against the bf16-consistent reference.
    assert jnp.allclose(y, y_ref_bf16, atol=1e-4, rtol=1e-4), "mismatch vs bf16 reference"
    # Loose check against the f32 dequant reference (bf16 MXU mantissa ~8 bits).
    assert jnp.allclose(y, y_ref_f32, atol=1e-2, rtol=1e-2), "mismatch vs f32 reference"

    print("KERNEL_OK")
</pallas_src>

<mosaic_0001>
module attributes {stable_mosaic.version = 11 : i64} {
  func.func @_woq_linear_kernel(%arg0: i32, %arg1: i32, %arg2: i32, %arg3: memref<8x256xf32, #tpu.memory_space<vmem>>, %arg4: memref<256x512xi8, #tpu.memory_space<vmem>>, %arg5: memref<1x512xf32, #tpu.memory_space<vmem>>, %arg6: memref<1x512xf32, #tpu.memory_space<vmem>>, %arg7: memref<8x512xf32, #tpu.memory_space<vmem>>, %arg8: memref<8x512xf32, #tpu.memory_space<vmem>>) attributes {dimension_semantics = [#tpu.dimension_semantics<parallel>, #tpu.dimension_semantics<parallel>, #tpu.dimension_semantics<arbitrary>], iteration_bounds = array<i64: 1, 1, 1>, scalar_prefetch = 0 : i64, scratch_operands = 1 : i64, tpu.core_type = #tpu.core_type<tc>, window_params = [{transform_indices = @transform_0, window_bounds = array<i64: 8, 256>}, {transform_indices = @transform_1, window_bounds = array<i64: 256, 512>}, {transform_indices = @transform_2, window_bounds = array<i64: 1, 512>}, {transform_indices = @transform_3, window_bounds = array<i64: 1, 512>}, {transform_indices = @transform_4, window_bounds = array<i64: 8, 512>}]} {
    %c0_i32 = arith.constant 0 : i32
    %0 = arith.cmpi eq, %arg2, %c0_i32 : i32
    %1 = arith.extui %0 : i1 to i32
    %c0_i32_0 = arith.constant 0 : i32
    %2 = arith.cmpi ne, %1, %c0_i32_0 : i32
    scf.if %2 {
      %cst_10 = arith.constant 0.000000e+00 : f32
      %14 = vector.broadcast %cst_10 : f32 to vector<8x512xf32>
      %c0_11 = arith.constant 0 : index
      %c0_12 = arith.constant 0 : index
      %15 = vector.load %arg8[%c0_11, %c0_12] : memref<8x512xf32, #tpu.memory_space<vmem>>, vector<8x512xf32>
      tpu.vector_store %arg8[%c0_11, %c0_12], %14 {strides = array<i32>} : memref<8x512xf32, #tpu.memory_space<vmem>>, vector<8x512xf32>,
    } else {
    }
    %c0 = arith.constant 0 : index
    %c0_1 = arith.constant 0 : index
    %3 = vector.load %arg3[%c0, %c0_1] : memref<8x256xf32, #tpu.memory_space<vmem>>, vector<8x256xf32>
    %4 = arith.truncf %3 : vector<8x256xf32> to vector<8x256xbf16>
    %c0_2 = arith.constant 0 : index
    %c0_3 = arith.constant 0 : index
    %5 = vector.load %arg4[%c0_2, %c0_3] : memref<256x512xi8, #tpu.memory_space<vmem>>, vector<256x512xi8>
    %6 = arith.sitofp %5 : vector<256x512xi8> to vector<256x512xbf16>
    %c0_4 = arith.constant 0 : index
    %c0_5 = arith.constant 0 : index
    %7 = vector.load %arg8[%c0_4, %c0_5] : memref<8x512xf32, #tpu.memory_space<vmem>>, vector<8x512xf32>
    %cst = arith.constant dense<0.000000e+00> : vector<8x512xf32>
    %8 = tpu.matmul %4, %6, %cst {dimension_numbers = #tpu.dot_dimension_numbers<[1], [0], [0], [1], [0, 0, 1, 1], [], []>} : vector<8x256xbf16>, vector<256x512xbf16>, vector<8x512xf32> -> vector<8x512xf32>
    %9 = arith.addf %7, %8 : vector<8x512xf32>
    %c0_6 = arith.constant 0 : index
    %c0_7 = arith.constant 0 : index
    %10 = vector.load %arg8[%c0_6, %c0_7] : memref<8x512xf32, #tpu.memory_space<vmem>>, vector<8x512xf32>
    tpu.vector_store %arg8[%c0_6, %c0_7], %9 {strides = array<i32>} : memref<8x512xf32, #tpu.memory_space<vmem>>, vector<8x512xf32>,
    %c0_i32_8 = arith.constant 0 : i32
    %11 = arith.cmpi eq, %arg2, %c0_i32_8 : i32
    %12 = arith.extui %11 : i1 to i32
    %c0_i32_9 = arith.constant 0 : i32
    %13 = arith.cmpi ne, %12, %c0_i32_9 : i32
    scf.if %13 {
      %c0_10 = arith.constant 0 : index
      %c0_11 = arith.constant 0 : index
      %14 = vector.load %arg8[%c0_10, %c0_11] : memref<8x512xf32, #tpu.memory_space<vmem>>, vector<8x512xf32>
      %c0_12 = arith.constant 0 : index
      %c0_13 = arith.constant 0 : index
      %15 = vector.load %arg5[%c0_12, %c0_13] : memref<1x512xf32, #tpu.memory_space<vmem>>, vector<1x512xf32>
      %16 = vector.broadcast %15 : vector<1x512xf32> to vector<8x512xf32>
      %17 = arith.mulf %14, %16 : vector<8x512xf32>
      %c0_14 = arith.constant 0 : index
      %c0_15 = arith.constant 0 : index
      %18 = vector.load %arg6[%c0_14, %c0_15] : memref<1x512xf32, #tpu.memory_space<vmem>>, vector<1x512xf32>
      %19 = vector.broadcast %18 : vector<1x512xf32> to vector<8x512xf32>
      %20 = arith.addf %17, %19 : vector<8x512xf32>
      %c0_16 = arith.constant 0 : index
      %c0_17 = arith.constant 0 : index
      %21 = vector.load %arg7[%c0_16, %c0_17] : memref<8x512xf32, #tpu.memory_space<vmem>>, vector<8x512xf32>
      tpu.vector_store %arg7[%c0_16, %c0_17], %20 {strides = array<i32>} : memref<8x512xf32, #tpu.memory_space<vmem>>, vector<8x512xf32>,
    } else {
    }
    return
  }
  func.func @transform_0(%arg0: i32, %arg1: i32, %arg2: i32) -> (i32, i32) {
    %c0_i32 = arith.constant 0 : i32
    return %arg0, %arg2 : i32, i32
  }
  func.func @transform_1(%arg0: i32, %arg1: i32, %arg2: i32) -> (i32, i32) {
    %c0_i32 = arith.constant 0 : i32
    return %arg2, %arg1 : i32, i32
  }
  func.func @transform_2(%arg0: i32, %arg1: i32, %arg2: i32) -> (i32, i32) {
    %c0_i32 = arith.constant 0 : i32
    %c0_i32_0 = arith.constant 0 : i32
    return %c0_i32, %arg1 : i32, i32
  }
  func.func @transform_3(%arg0: i32, %arg1: i32, %arg2: i32) -> (i32, i32) {
    %c0_i32 = arith.constant 0 : i32
    %c0_i32_0 = arith.constant 0 : i32
    return %c0_i32, %arg1 : i32, i32
  }
  func.func @transform_4(%arg0: i32, %arg1: i32, %arg2: i32) -> (i32, i32) {
    %c0_i32 = arith.constant 0 : i32
    return %arg0, %arg1 : i32, i32
  }
}

</mosaic_0001>

<bundles_post_ra>
// kernel: woq_int8_linear.1
= control target key start
LH: loop header
LB: loop body
LE: loop exit
PB: predicated region body
PF: predicated region fallthrough
CT: control target
= control target key end

     0   :  { %9 = vsyncpa [#allocation4], 0  ;;  %s566_s0 = inlined_call_operand.hbm [shape: f32[8,256], index: 0, kind: input, shape index: {}]   ;;  %s567_s1 = inlined_call_operand.hbm [shape: s8[256,512], index: 1, kind: input, shape index: {}]   ;;  %s568_s2 = inlined_call_operand.hbm [shape: f32[1,512], index: 2, kind: input, shape index: {}]   ;;  %s569_s3 = inlined_call_operand.hbm [shape: f32[1,512], index: 3, kind: input, shape index: {}]   ;;  %s570_s4 = inlined_call_operand.hbm [shape: f32[8,512], index: 4, kind: output, shape index: {}]  }
   0x1   :  { %10 = vsyncpa [#allocation7], 0 }
   0x2   :  { %11 = vsyncpa [#allocation10], 0 }
   0x3   :  { %12 = vsyncpa [#allocation5], 0  ;;  %s474_s15 = smov [#allocation6]   ;;  %s356_s19 = scalar_lea.hbm %s567_s1, 4096 }
   0x4   :  { %s28_s16 = sshll.u32 %s474_s15, 4  ;;  %p357_p0 = scmp.ne.s32.totalorder %s567_s1, %s356_s19  ;;  %s29_s16 = int_to_ptr.vmem [resolvable:$true] %s28_s16 }
   0x5   :  { %p360_p1 = scmp.lt.u32.totalorder %s356_s19, %s567_s1 }
   0x7   :  { %p362_p2 = pnand %p360_p1, %p357_p0 }
   0x9   :  { %365 = shalt.err (!%p362_p2)
}
   0xa   :  { %s366_s24 = scalar_lea.vmem %s29_s16, 4096  ;;  %p371_p4 = scmp.lt.s32.totalorder %s29_s16, %s29_s16 }
   0xb   :  { %p367_p3 = scmp.ne.s32.totalorder %s29_s16, %s366_s24  ;;  %p372_p5 = scmp.lt.s32.totalorder %s366_s24, %s366_s24 }
   0xd   :  { %p373_p6 = por %p372_p5, %p371_p4 }
   0xf   :  { %p374_p7 = pnand %p373_p6, %p367_p3 }
  0x11   :  { %377 = shalt.err (!%p374_p7)
}
  0x12   :  { %s475_s25 = smov 512   ;;  %s476_s26 = smov 32  }
  0x13   :  { %34 = dma.hbm_to_vmem [thread:$0]  %s567_s1, 4096, %s29_s16, [#allocation7], %s475_s25, %s475_s25, %s476_s26  }
  0x14   :  { %s477_s29 = smov [#allocation3]   ;;  %s478_s5 = smov [#allocation8]  }
  0x15   :  { %s19_s30 = sshll.u32 %s477_s29, 4  ;;  %s41_s6 = sshll.u32 %s478_s5, 4  ;;  %s20_s30 = int_to_ptr.vmem [resolvable:$true] %s19_s30  ;;  %s42_s6 = int_to_ptr.vmem [resolvable:$true] %s41_s6 }
  0x16   :  { %s378_s9 = scalar_lea.hbm %s566_s0, 256 }
  0x17   :  { %p379_p8 = scmp.ne.s32.totalorder %s566_s0, %s378_s9  ;;  %p382_p9 = scmp.lt.u32.totalorder %s378_s9, %s566_s0 }
  0x19   :  { %p384_p10 = pnand %p382_p9, %p379_p8 }
  0x1b   :  { %387 = shalt.err (!%p384_p10)
}
  0x1c   :  { %s388_s1 = scalar_lea.vmem %s20_s30, 256  ;;  %p393_p12 = scmp.lt.s32.totalorder %s20_s30, %s20_s30 }
  0x1d   :  { %p389_p11 = scmp.ne.s32.totalorder %s20_s30, %s388_s1  ;;  %p394_p13 = scmp.lt.s32.totalorder %s388_s1, %s388_s1 }
  0x1f   :  { %p395_p0 = por %p394_p13, %p393_p12 }
  0x21   :  { %p396_p1 = pnand %p395_p0, %p389_p11 }
  0x23   :  { %399 = shalt.err (!%p396_p1)
}
  0x24   :  { %22 = dma.hbm_to_vmem [thread:$0]  %s566_s0, 256, %s20_s30, [#allocation4]  }
  0x25   :  { %s400_s18 = scalar_lea.hbm %s568_s2, 64 }
  0x26   :  { %p401_p2 = scmp.ne.s32.totalorder %s568_s2, %s400_s18  ;;  %p404_p3 = scmp.lt.u32.totalorder %s400_s18, %s568_s2 }
  0x28   :  { %p406_p4 = pnand %p404_p3, %p401_p2 }
  0x2a   :  { %409 = shalt.err (!%p406_p4)
}
  0x2b   :  { %s410_s23 = scalar_lea.vmem %s42_s6, 64  ;;  %p415_p6 = scmp.lt.s32.totalorder %s42_s6, %s42_s6 }
  0x2c   :  { %p411_p5 = scmp.ne.s32.totalorder %s42_s6, %s410_s23  ;;  %p416_p7 = scmp.lt.s32.totalorder %s410_s23, %s410_s23 }
  0x2e   :  { %p417_p8 = por %p416_p7, %p415_p6 }
  0x30   :  { %p418_p9 = pnand %p417_p8, %p411_p5 }
  0x32   :  { %421 = shalt.err (!%p418_p9)
}
  0x33   :  { %44 = dma.hbm_to_vmem [thread:$0]  %s568_s2, 64, %s42_s6, [#allocation7]  }
  0x34   :  { %s479_s25 = smov [#allocation9]   ;;  %s422_s29 = scalar_lea.hbm %s569_s3, 64 }
  0x35   :  { %s51_s26 = sshll.u32 %s479_s25, 4  ;;  %p423_p10 = scmp.ne.s32.totalorder %s569_s3, %s422_s29  ;;  %s52_s26 = int_to_ptr.vmem [resolvable:$true] %s51_s26 }
  0x36   :  { %p426_p11 = scmp.lt.u32.totalorder %s422_s29, %s569_s3 }
  0x38   :  { %p428_p12 = pnand %p426_p11, %p423_p10 }
  0x3a   :  { %431 = shalt.err (!%p428_p12)
}
  0x3b   :  { %s432_s9 = scalar_lea.vmem %s52_s26, 64  ;;  %p437_p0 = scmp.lt.s32.totalorder %s52_s26, %s52_s26 }
  0x3c   :  { %p433_p13 = scmp.ne.s32.totalorder %s52_s26, %s432_s9  ;;  %p438_p1 = scmp.lt.s32.totalorder %s432_s9, %s432_s9 }
  0x3e   :  { %p439_p2 = por %p438_p1, %p437_p0 }
  0x40   :  { %p440_p3 = pnand %p439_p2, %p433_p13 }
  0x42   :  { %443 = shalt.err (!%p440_p3)
}
  0x43   :  { %54 = dma.hbm_to_vmem [thread:$0]  %s569_s3, 64, %s52_s26, [#allocation10]  }
  0x44   :  { %466 = dma.done.wait [#allocation4], 256  }
  0x45   :  { %467 = vsyncadd [#allocation4], 4294967040 }
  0x46   :  { %468 = dma.done.wait [#allocation7], 4160  }
  0x47   :  { %469 = vsyncadd [#allocation7], 4294963136 }
  0x48   :  { %470 = dma.done.wait [#allocation10], 64  }
  0x49   :  { %471 = vsyncadd [#allocation10], 4294967232  ;;  %v80_v0 = vld [vmem:[#allocation6 + $0x8] sm:$0xff]  ;;  %v82_v1 = vld [vmem:[#allocation6 + $0x18] sm:$0xff]  ;;  %s480_s3 = smov [#allocation11]  }
  0x4a   :  { %v79_v2 = vld [vmem:[#allocation6] sm:$0xff]  ;;  %v112_v3 = vunpack.c.l.s8.bf16 %v80_v0  ;;  %v116_v4 = vunpack.c.h.s8.bf16 %v80_v0  ;;  %v114_v5 = vunpack.c.l.s8.bf16 %v82_v1  ;;  %v118_v6 = vunpack.c.h.s8.bf16 %v82_v1  ;;  %v81_v7 = vld [vmem:[#allocation6 + $0x10] sm:$0xff]  ;;  %v84_v10 = vld [vmem:[#allocation6 + $0x28] sm:$0xff]  ;;  %s338_s10 = sshll.u32 %s480_s3, 4  ;;  %s339_s10 = int_to_ptr.vmem [resolvable:$true] %s338_s10 }
  0x4b   :  { %v111_v8 = vunpack.c.l.s8.bf16 %v79_v2  ;;  %v113_v9 = vunpack.c.l.s8.bf16 %v81_v7  ;;  %v86_v11 = vld [vmem:[#allocation6 + $0x38] sm:$0xff]  ;;  %v115_v12 = vunpack.c.h.s8.bf16 %v79_v2  ;;  %v117_v13 = vunpack.c.h.s8.bf16 %v81_v7  ;;  %v83_v16 = vld [vmem:[#allocation6 + $0x20] sm:$0xff]  ;;  %v85_v17 = vld [vmem:[#allocation6 + $0x30] sm:$0xff]  ;;  %s444_s11 = scalar_lea.vmem %s339_s10, 512  ;;  %p449_p5 = scmp.lt.s32.totalorder %s339_s10, %s339_s10 }
  0x4c   :  { %179 = vmatprep.subr.bf16.mxu0 %v112_v3  ;;  %220 = vmatprep.subr.bf16.mxu1 %v114_v5  ;;  %v120_v14 = vunpack.c.l.s8.bf16 %v84_v10  ;;  %v122_v15 = vunpack.c.l.s8.bf16 %v86_v11  ;;  %v119_v18 = vunpack.c.l.s8.bf16 %v83_v16  ;;  %v121_v19 = vunpack.c.l.s8.bf16 %v85_v17  ;;  %v88_v22 = vld [vmem:[#allocation6 + $0x48] sm:$0xff]  ;;  %v90_v23 = vld [vmem:[#allocation6 + $0x58] sm:$0xff]  ;;  %v87_v28 = vld [vmem:[#allocation6 + $0x40] sm:$0xff]  ;;  %p445_p4 = scmp.ne.s32.totalorder %s339_s10, %s444_s11  ;;  %p450_p6 = scmp.lt.s32.totalorder %s444_s11, %s444_s11 }
  0x4d   :  { %180 = vmatpush1.bf16.msra.mxu0 %v111_v8  ;;  %221 = vmatpush1.bf16.msra.mxu1 %v113_v9  ;;  %v124_v20 = vunpack.c.h.s8.bf16 %v84_v10  ;;  %v126_v21 = vunpack.c.h.s8.bf16 %v86_v11  ;;  %v123_v24 = vunpack.c.h.s8.bf16 %v83_v16  ;;  %v125_v25 = vunpack.c.h.s8.bf16 %v85_v17  ;;  %v89_v29 = vld [vmem:[#allocation6 + $0x50] sm:$0xff]  ;;  %v76_v30 = vld [vmem:[#allocation3 + $0x8] sm:$0xff]  ;;  %v92_v36 = vld [vmem:[#allocation6 + $0x68] sm:$0xff] }
  0x4e   :  { %181 = vmatprep.subr.bf16.mxu0 %v116_v4  ;;  %222 = vmatprep.subr.bf16.mxu1 %v118_v6  ;;  %v128_v26 = vunpack.c.l.s8.bf16 %v88_v22  ;;  %v130_v27 = vunpack.c.l.s8.bf16 %v90_v23  ;;  %v127_v31 = vunpack.c.l.s8.bf16 %v87_v28  ;;  %v129_v32 = vunpack.c.l.s8.bf16 %v89_v29  ;;  %v94_v37 = vld [vmem:[#allocation6 + $0x78] sm:$0xff]  ;;  %v91_v42 = vld [vmem:[#allocation6 + $0x60] sm:$0xff]  ;;  %v93_v43 = vld [vmem:[#allocation6 + $0x70] sm:$0xff]  ;;  %p451_p7 = por %p450_p6, %p449_p5 }
  0x4f   :  { %v132_v33 = vunpack.c.h.s8.bf16 %v88_v22  ;;  %v134_v34 = vunpack.c.h.s8.bf16 %v90_v23  ;;  %v78_v35 = vpack.c.bf16 %v76_v30, %v76_v30  ;;  %v131_v38 = vunpack.c.h.s8.bf16 %v87_v28  ;;  %v96_v48 = vld [vmem:[#allocation6 + $0x88] sm:$0xff]  ;;  %v98_v49 = vld [vmem:[#allocation6 + $0x98] sm:$0xff]  ;;  %v95_v54 = vld [vmem:[#allocation6 + $0x80] sm:$0xff] }
  0x50   :  { %v133_v39 = vunpack.c.h.s8.bf16 %v89_v29  ;;  %v136_v40 = vunpack.c.l.s8.bf16 %v92_v36  ;;  %v138_v41 = vunpack.c.l.s8.bf16 %v94_v37  ;;  %v135_v44 = vunpack.c.l.s8.bf16 %v91_v42  ;;  %v97_v55 = vld [vmem:[#allocation6 + $0x90] sm:$0xff]  ;;  %v100_v60 = vld [vmem:[#allocation6 + $0xa8] sm:$0xff]  ;;  %v102_v61 = vld [vmem:[#allocation6 + $0xb8] sm:$0xff]  ;;  %p452_p8 = pnand %p451_p7, %p445_p4 }
  0x51   :  { %182 = vmatpush1.bf16.msra.mxu0 %v115_v12  ;;  %223 = vmatpush1.bf16.msra.mxu1 %v117_v13  ;;  %v137_v45 = vunpack.c.l.s8.bf16 %v93_v43  ;;  %v140_v46 = vunpack.c.h.s8.bf16 %v92_v36  ;;  %v142_v47 = vunpack.c.h.s8.bf16 %v94_v37  ;;  %v139_v50 = vunpack.c.h.s8.bf16 %v91_v42  ;;  %v99_v2 = vld [vmem:[#allocation6 + $0xa0] sm:$0xff]  ;;  %v101_v3 = vld [vmem:[#allocation6 + $0xb0] sm:$0xff]  ;;  %v104_v8 = vld [vmem:[#allocation6 + $0xc8] sm:$0xff] }
  0x52   :  { %183 = vmatprep.subr.bf16.mxu0 %v120_v14  ;;  %224 = vmatprep.subr.bf16.mxu1 %v122_v15  ;;  %v141_v51 = vunpack.c.h.s8.bf16 %v93_v43  ;;  %v144_v52 = vunpack.c.l.s8.bf16 %v96_v48  ;;  %v146_v53 = vunpack.c.l.s8.bf16 %v98_v49  ;;  %v143_v56 = vunpack.c.l.s8.bf16 %v95_v54  ;;  %v106_v9 = vld [vmem:[#allocation6 + $0xd8] sm:$0xff]  ;;  %v103_v14 = vld [vmem:[#allocation6 + $0xc0] sm:$0xff]  ;;  %v105_v15 = vld [vmem:[#allocation6 + $0xd0] sm:$0xff] }
  0x53   :  { %211 = vmatprep.mubr.bf16.mxu0 %v78_v35  ;;  %252 = vmatprep.mubr.bf16.mxu1 %v78_v35  ;;  %v145_v57 = vunpack.c.l.s8.bf16 %v97_v55  ;;  %v148_v58 = vunpack.c.h.s8.bf16 %v96_v48  ;;  %v150_v59 = vunpack.c.h.s8.bf16 %v98_v49  ;;  %v147_v62 = vunpack.c.h.s8.bf16 %v95_v54  ;;  %v302_v43 = vld [vmem:[#allocation9] sm:$0xf] }
  0x54   :  { %v149_v63 = vunpack.c.h.s8.bf16 %v97_v55  ;;  %v152_v0 = vunpack.c.l.s8.bf16 %v100_v60  ;;  %v154_v1 = vunpack.c.l.s8.bf16 %v102_v61  ;;  %v151_v4 = vunpack.c.l.s8.bf16 %v99_v2 }
  0x55   :  { %184 = vmatpush1.bf16.msra.mxu0 %v119_v18  ;;  %225 = vmatpush1.bf16.msra.mxu1 %v121_v19  ;;  %v153_v5 = vunpack.c.l.s8.bf16 %v101_v3  ;;  %v156_v6 = vunpack.c.h.s8.bf16 %v100_v60  ;;  %v158_v7 = vunpack.c.h.s8.bf16 %v102_v61  ;;  %v155_v10 = vunpack.c.h.s8.bf16 %v99_v2 }
  0x56   :  { %185 = vmatprep.subr.bf16.mxu0 %v124_v20  ;;  %226 = vmatprep.subr.bf16.mxu1 %v126_v21  ;;  %v157_v11 = vunpack.c.h.s8.bf16 %v101_v3  ;;  %v160_v12 = vunpack.c.l.s8.bf16 %v104_v8  ;;  %v162_v13 = vunpack.c.l.s8.bf16 %v106_v9  ;;  %v159_v16 = vunpack.c.l.s8.bf16 %v103_v14  ;;  %v108_v20 = vld [vmem:[#allocation6 + $0xe8] sm:$0xff]  ;;  %v110_v21 = vld [vmem:[#allocation6 + $0xf8] sm:$0xff] }
  0x57   :  { %v161_v17 = vunpack.c.l.s8.bf16 %v105_v15  ;;  %v164_v18 = vunpack.c.h.s8.bf16 %v104_v8  ;;  %v166_v19 = vunpack.c.h.s8.bf16 %v106_v9  ;;  %v163_v22 = vunpack.c.h.s8.bf16 %v103_v14 }
  0x58   :  { %v165_v23 = vunpack.c.h.s8.bf16 %v105_v15  ;;  %v172_v30 = vunpack.c.h.s8.bf16 %v108_v20  ;;  %v278_v36 = vlaneseq }
  0x59   :  { %186 = vmatpush1.bf16.msra.mxu0 %v123_v24  ;;  %227 = vmatpush1.bf16.msra.mxu1 %v125_v25  ;;  %v168_v24 = vunpack.c.l.s8.bf16 %v108_v20  ;;  %v170_v25 = vunpack.c.l.s8.bf16 %v110_v21 }
  0x5a   :  { %187 = vmatprep.subr.bf16.mxu0 %v128_v26  ;;  %228 = vmatprep.subr.bf16.mxu1 %v130_v27  ;;  %v107_v26 = vld [vmem:[#allocation6 + $0xe0] sm:$0xff]  ;;  %v109_v27 = vld [vmem:[#allocation6 + $0xf0] sm:$0xff]  ;;  %v279_v37 = vshrl.u32 %v278_v36, 7 }
  0x5b   :  { %v167_v28 = vunpack.c.l.s8.bf16 %v107_v26  ;;  %v169_v29 = vunpack.c.l.s8.bf16 %v109_v27 }
  0x5c   :  { %v292_v42 = vsub.s32 3, %v279_v37 }
  0x5d   :  { %188 = vmatpush1.bf16.msra.mxu0 %v127_v31  ;;  %229 = vmatpush1.bf16.msra.mxu1 %v129_v32  ;;  %v174_v31 = vunpack.c.h.s8.bf16 %v110_v21  ;;  %v171_v32 = vunpack.c.h.s8.bf16 %v107_v26 }
  0x5e   :  { %189 = vmatprep.subr.bf16.mxu0 %v132_v33  ;;  %230 = vmatprep.subr.bf16.mxu1 %v134_v34  ;;  %v173_v33 = vunpack.c.h.s8.bf16 %v109_v27  ;;  %v75_v34 = vld [vmem:[#allocation3] sm:$0xff] }
  0x5f   :  { %v77_v35 = vpack.c.bf16 %v75_v34, %v75_v34 }
  0x61   :  { %190 = vmatpush1.bf16.msra.mxu0 %v131_v38  ;;  %231 = vmatpush1.bf16.msra.mxu1 %v133_v39  ;;  %v280_v38 = vsub.s32 0, %v279_v37  ;;  %v288_v39 = vsub.s32 2, %v279_v37 }
  0x62   :  { %191 = vmatprep.subr.bf16.mxu0 %v136_v40  ;;  %232 = vmatprep.subr.bf16.mxu1 %v138_v41  ;;  %v276_v40 = vld [vmem:[#allocation8] sm:$0xf]  ;;  %v284_v41 = vsub.s32 1, %v279_v37 }
  0x63   :  { %v307_v48 = vrot.slane %v302_v43, %v280_v38  ;;  %v315_v49 = vrot.slane %v302_v43, %v288_v39 }
  0x65   :  { %192 = vmatpush1.bf16.msra.mxu0 %v135_v44  ;;  %233 = vmatpush1.bf16.msra.mxu1 %v137_v45  ;;  %v281_v44 = vrot.slane %v276_v40, %v280_v38  ;;  %v289_v45 = vrot.slane %v276_v40, %v288_v39 }
  0x66   :  { %193 = vmatprep.subr.bf16.mxu0 %v140_v46  ;;  %234 = vmatprep.subr.bf16.mxu1 %v142_v47  ;;  %v285_v46 = vrot.slane %v276_v40, %v284_v41  ;;  %v293_v47 = vrot.slane %v276_v40, %v292_v42 }
  0x69   :  { %194 = vmatpush1.bf16.msra.mxu0 %v139_v50  ;;  %235 = vmatpush1.bf16.msra.mxu1 %v141_v51 }
  0x6a   :  { %195 = vmatprep.subr.bf16.mxu0 %v144_v52  ;;  %236 = vmatprep.subr.bf16.mxu1 %v146_v53  ;;  %v311_v52 = vrot.slane %v302_v43, %v284_v41  ;;  %v319_v53 = vrot.slane %v302_v43, %v292_v42 }
  0x6d   :  { %196 = vmatpush1.bf16.msra.mxu0 %v143_v56  ;;  %237 = vmatpush1.bf16.msra.mxu1 %v145_v57 }
  0x6e   :  { %197 = vmatprep.subr.bf16.mxu0 %v148_v58  ;;  %238 = vmatprep.subr.bf16.mxu1 %v150_v59 }
  0x71   :  { %198 = vmatpush1.bf16.msra.mxu0 %v147_v62  ;;  %239 = vmatpush1.bf16.msra.mxu1 %v149_v63 }
  0x72   :  { %199 = vmatprep.subr.bf16.mxu0 %v152_v0  ;;  %240 = vmatprep.subr.bf16.mxu1 %v154_v1 }
  0x75   :  { %200 = vmatpush1.bf16.msra.mxu0 %v151_v4  ;;  %241 = vmatpush1.bf16.msra.mxu1 %v153_v5 }
  0x76   :  { %201 = vmatprep.subr.bf16.mxu0 %v156_v6  ;;  %242 = vmatprep.subr.bf16.mxu1 %v158_v7 }
  0x79   :  { %202 = vmatpush1.bf16.msra.mxu0 %v155_v10  ;;  %243 = vmatpush1.bf16.msra.mxu1 %v157_v11 }
  0x7a   :  { %203 = vmatprep.subr.bf16.mxu0 %v160_v12  ;;  %244 = vmatprep.subr.bf16.mxu1 %v162_v13 }
  0x7d   :  { %204 = vmatpush1.bf16.msra.mxu0 %v159_v16  ;;  %245 = vmatpush1.bf16.msra.mxu1 %v161_v17 }
  0x7e   :  { %205 = vmatprep.subr.bf16.mxu0 %v164_v18  ;;  %246 = vmatprep.subr.bf16.mxu1 %v166_v19 }
  0x81   :  { %206 = vmatpush1.bf16.msra.mxu0 %v163_v22  ;;  %247 = vmatpush1.bf16.msra.mxu1 %v165_v23 }
  0x82   :  { %207 = vmatprep.subr.bf16.mxu0 %v168_v24  ;;  %248 = vmatprep.subr.bf16.mxu1 %v170_v25 }
  0x85   :  { %208 = vmatpush1.bf16.msra.mxu0 %v167_v28  ;;  %249 = vmatpush1.bf16.msra.mxu1 %v169_v29 }
  0x86   :  { %209 = vmatprep.subr.bf16.mxu0 %v172_v30  ;;  %250 = vmatprep.subr.bf16.mxu1 %v174_v31 }
  0x89   :  { %210 = vmatpush1.bf16.msra.mxu0 %v171_v32  ;;  %251 = vmatpush1.bf16.msra.mxu1 %v173_v33 }
  0x8c   :  { %212 = vmatmul.mubr.bf16.vlgmr.msra.gmra.mrb[0].mxu0 %v77_v35  ;;  %253 = vmatmul.mubr.bf16.vlgmr.msra.gmra.mrb[0].mxu1 %v77_v35 }
 0x15f   :  { %v213_v50 = vpop.f32.mrb[0].mxu0  ;;  %v254_v51 = vpop.f32.mrb[0].mxu1 }
 0x160   :  { %v298_v54 = vmul.f32 %v281_v44, %v213_v50  ;;  %v300_v55 = vmul.f32 %v289_v45, %v254_v51  ;;  %v215_v56 = vpop.f32.mrb[1].mxu0  ;;  %v256_v57 = vpop.f32.mrb[1].mxu1 }
 0x161   :  { %v299_v58 = vmul.f32 %v285_v46, %v215_v56  ;;  %v301_v59 = vmul.f32 %v293_v47, %v256_v57  ;;  %v217_v60 = vpop.f32.mrb[2].mxu0  ;;  %v258_v61 = vpop.f32.mrb[2].mxu1 }
 0x162   :  { %v324_v62 = vadd.f32 %v307_v48, %v298_v54  ;;  %v326_v63 = vadd.f32 %v315_v49, %v300_v55  ;;  %v218_v0 = vpop.f32.mrb[3].mxu0  ;;  %v259_v1 = vpop.f32.mrb[3].mxu1 }
 0x163   :  { %v325_v2 = vadd.f32 %v311_v52, %v299_v58  ;;  %v327_v3 = vadd.f32 %v319_v53, %v301_v59 }
 0x164   :  { %328 = vst [vmem:[#allocation11] sm:$0xff] %v324_v62  ;;  %330 = vst [vmem:[#allocation11 + $0x10] sm:$0xff] %v326_v63 }
 0x165   :  { %329 = vst [vmem:[#allocation11 + $0x8] sm:$0xff] %v325_v2  ;;  %331 = vst [vmem:[#allocation11 + $0x18] sm:$0xff] %v327_v3 }
 0x166   :  { %455 = shalt.err (!%p452_p8)
}
 0x167   :  { %s456_s1 = scalar_lea.hbm %s570_s4, 512 }
 0x168   :  { %p457_p9 = scmp.ne.s32.totalorder %s570_s4, %s456_s1  ;;  %p460_p10 = scmp.lt.u32.totalorder %s456_s1, %s570_s4 }
 0x16a   :  { %p462_p11 = pnand %p460_p10, %p457_p9 }
 0x16c   :  { %465 = shalt.err (!%p462_p11)
}
 0x16d   :  { %341 = dma.vmem_to_hbm [thread:$0]  %s339_s10, 512, %s570_s4, [#allocation5]  }
 0x16e   :  { %472 = dma.done.wait [#allocation5], 512  }
 0x16f   :  { %473 = vsyncadd [#allocation5], 4294966784 }
 0x170   :  { %345 = vsyncpa [#allocation4], 1 }
 0x171   :  { %346 = vsyncpa [#allocation7], 1 }
 0x172   :  { %347 = vsyncpa [#allocation10], 1 }
 0x173   :  { %348 = vsyncpa [#allocation5], 1 }

</bundles_post_ra>
